<compile_context>
chip_gen: v6e
topology: v6e:2x2x1
jax: 0.10.0
libtpu: 0.0.40
codegen_flags: <defaults>
</compile_context>

<pallas_src>
import jax
import jax.numpy as jnp
from jax.experimental import pallas as pl
from jax.experimental.pallas import tpu as pltpu

N_OUT = 115   # nn.Linear(graph_dim, 115)
N_PAD = 128   # lane-dense padded feature dim


def _softmax0_linear(x, w_padT, b_pad):
    """logits = x @ W_padT + b_pad; softmax over axis 0 (rows, per column)."""
    logits = jnp.dot(x, w_padT, preferred_element_type=jnp.float32) + b_pad
    m = jnp.max(logits, axis=0, keepdims=True)
    e = jnp.exp(logits - m)
    denom = jnp.sum(e, axis=0, keepdims=True)
    # Exact divide (not approx EUP reciprocal): kernel is launch-bound, and
    # exact normalization keeps columns summing to 1 for downstream sampling.
    return e / denom


def _f_addnode_kernel(x_ref, w_ref, b_ref, o_ref):
    # Single problem: x (B, K) -> o (B, 128)
    o_ref[...] = _softmax0_linear(x_ref[...], w_ref[...], b_ref[...]).astype(o_ref.dtype)


def _f_addnode_batched_kernel(x_ref, w_ref, b_ref, o_ref):
    # One grid step = one graph: x block (1, B, K) -> o block (1, B, 128)
    o_ref[0] = _softmax0_linear(x_ref[0], w_ref[...], b_ref[...]).astype(o_ref.dtype)


def prepare_params(weight, bias):
    """One-time parameter prep (init time, NOT per forward call).

    weight: (115, K) as in nn.Linear -> (K, 128) pre-transposed, zero-padded
    bias:   (115,)                   -> (1, 128) zero-padded
    """
    K = weight.shape[1]
    w_padT = jnp.zeros((K, N_PAD), dtype=weight.dtype).at[:, :N_OUT].set(weight.T)
    b_pad = jnp.zeros((1, N_PAD), dtype=bias.dtype).at[:, :N_OUT].set(bias)
    return w_padT, b_pad


def f_addnode_forward(h_G, w_padT, b_pad):
    """Single problem. h_G: (B, K) f32 -> (B, 128) padded output.

    Lanes 0..114 hold softmax(fan(h_G), dim=0); lanes 115..127 are padding
    (softmax of zero logits) and must be ignored by the consumer.  The slice
    is intentionally NOT done here (extra XLA op ~doubles latency of this
    overhead-bound kernel).
    """
    B = h_G.shape[0]
    return pl.pallas_call(
        _f_addnode_kernel,
        out_shape=jax.ShapeDtypeStruct((B, N_PAD), h_G.dtype),
        in_specs=[
            pl.BlockSpec(memory_space=pltpu.MemorySpace.VMEM),
            pl.BlockSpec(memory_space=pltpu.MemorySpace.VMEM),
            pl.BlockSpec(memory_space=pltpu.MemorySpace.VMEM),
        ],
        out_specs=pl.BlockSpec(memory_space=pltpu.MemorySpace.VMEM),
    )(h_G, w_padT, b_pad)


def f_addnode_forward_batched(h_stack, w_padT, b_pad):
    """G stacked problems in ONE pallas_call.

    h_stack: (G, B, K) f32 -> (G, B, 128) padded output.  Leading grid axis is
    marked "parallel" so v7x shards the G problems across its 2 TensorCores;
    v5e/v6e simply loop (still amortizing dispatch overhead G-fold).
    """
    G, B, K = h_stack.shape
    return pl.pallas_call(
        _f_addnode_batched_kernel,
        out_shape=jax.ShapeDtypeStruct((G, B, N_PAD), h_stack.dtype),
        grid=(G,),
        in_specs=[
            pl.BlockSpec((1, B, K), lambda g: (g, 0, 0)),
            pl.BlockSpec((K, N_PAD), lambda g: (0, 0)),
            pl.BlockSpec((1, N_PAD), lambda g: (0, 0)),
        ],
        out_specs=pl.BlockSpec((1, B, N_PAD), lambda g: (g, 0, 0)),
        compiler_params=pltpu.CompilerParams(
            dimension_semantics=("parallel",)),
    )(h_stack, w_padT, b_pad)


if __name__ == "__main__":
    graph_dim = 32
    batch = 8
    n_graphs = 4

    key = jax.random.PRNGKey(0)
    k_x, k_w, k_b, k_s = jax.random.split(key, 4)

    # Deterministic init mimicking nn.Linear uniform(-1/sqrt(K), 1/sqrt(K))
    bound = 1.0 / (graph_dim ** 0.5)
    weight = jax.random.uniform(k_w, (N_OUT, graph_dim),
                                minval=-bound, maxval=bound, dtype=jnp.float32)
    bias = jax.random.uniform(k_b, (N_OUT,),
                              minval=-bound, maxval=bound, dtype=jnp.float32)
    h_G = jax.random.normal(k_x, (batch, graph_dim), dtype=jnp.float32)
    h_stack = jax.random.normal(k_s, (n_graphs, batch, graph_dim),
                                dtype=jnp.float32)

    # Init-time parameter prep (transpose + lane-dense pad), hoisted out of
    # the per-call path.
    w_padT, b_pad = prepare_params(weight, bias)

    # --- single-problem path -------------------------------------------------
    fwd = jax.jit(f_addnode_forward)
    out_padded = jax.block_until_ready(fwd(h_G, w_padT, b_pad))
    assert out_padded.shape == (batch, N_PAD)
    out = out_padded[:, :N_OUT]          # test-harness-only slice
    ref = jax.nn.softmax(h_G @ weight.T + bias, axis=0)
    err = float(jnp.max(jnp.abs(out - ref)))
    assert jnp.allclose(out, ref, atol=1e-4, rtol=1e-4), err

    # --- batched path (G problems, one pallas_call) --------------------------
    fwd_b = jax.jit(f_addnode_forward_batched)
    out_b_padded = jax.block_until_ready(fwd_b(h_stack, w_padT, b_pad))
    assert out_b_padded.shape == (n_graphs, batch, N_PAD)
    out_b = out_b_padded[:, :, :N_OUT]   # test-harness-only slice
    ref_b = jax.nn.softmax(
        jnp.einsum('gbk,nk->gbn', h_stack, weight) + bias, axis=1)
    err_b = float(jnp.max(jnp.abs(out_b - ref_b)))
    assert jnp.allclose(out_b, ref_b, atol=1e-4, rtol=1e-4), err_b

    print("KERNEL_OK")
</pallas_src>

<mosaic_0001>
module attributes {stable_mosaic.version = 11 : i64} {
  func.func @_f_addnode_kernel(%arg0: memref<8x32xf32, #tpu.memory_space<vmem>>, %arg1: memref<32x128xf32, #tpu.memory_space<vmem>>, %arg2: memref<1x128xf32, #tpu.memory_space<vmem>>, %arg3: memref<8x128xf32, #tpu.memory_space<vmem>>) attributes {dimension_semantics = [], scalar_prefetch = 0 : i64, scratch_operands = 0 : i64, tpu.core_type = #tpu.core_type<tc>} {
    %c0 = arith.constant 0 : index
    %c0_0 = arith.constant 0 : index
    %0 = vector.load %arg0[%c0, %c0_0] : memref<8x32xf32, #tpu.memory_space<vmem>>, vector<8x32xf32>
    %c0_1 = arith.constant 0 : index
    %c0_2 = arith.constant 0 : index
    %1 = vector.load %arg1[%c0_1, %c0_2] : memref<32x128xf32, #tpu.memory_space<vmem>>, vector<32x128xf32>
    %c0_3 = arith.constant 0 : index
    %c0_4 = arith.constant 0 : index
    %2 = vector.load %arg2[%c0_3, %c0_4] : memref<1x128xf32, #tpu.memory_space<vmem>>, vector<1x128xf32>
    %cst = arith.constant dense<0.000000e+00> : vector<8x128xf32>
    %3 = tpu.matmul %0, %1, %cst {dimension_numbers = #tpu.dot_dimension_numbers<[1], [0], [0], [1], [0, 0, 1, 1], [], []>} : vector<8x32xf32>, vector<32x128xf32>, vector<8x128xf32> -> vector<8x128xf32>
    %4 = vector.broadcast %2 : vector<1x128xf32> to vector<8x128xf32>
    %5 = arith.addf %3, %4 : vector<8x128xf32>
    %cst_5 = arith.constant dense<0xFF800000> : vector<128xf32>
    %6 = vector.multi_reduction <maximumf>, %5, %cst_5 [0] : vector<8x128xf32> to vector<128xf32>
    %7 = vector.shape_cast %6 : vector<128xf32> to vector<1x128xf32>
    %8 = vector.broadcast %7 : vector<1x128xf32> to vector<8x128xf32>
    %9 = arith.subf %5, %8 : vector<8x128xf32>
    %10 = math.exp %9 : vector<8x128xf32>
    %cst_6 = arith.constant dense<0.000000e+00> : vector<128xf32>
    %11 = vector.multi_reduction <add>, %10, %cst_6 [0] : vector<8x128xf32> to vector<128xf32>
    %12 = vector.shape_cast %11 : vector<128xf32> to vector<1x128xf32>
    %13 = vector.broadcast %12 : vector<1x128xf32> to vector<8x128xf32>
    %14 = arith.divf %10, %13 : vector<8x128xf32>
    %c0_7 = arith.constant 0 : index
    %c0_8 = arith.constant 0 : index
    %15 = vector.load %arg3[%c0_7, %c0_8] : memref<8x128xf32, #tpu.memory_space<vmem>>, vector<8x128xf32>
    tpu.vector_store %arg3[%c0_7, %c0_8], %14 {strides = array<i32>} : memref<8x128xf32, #tpu.memory_space<vmem>>, vector<8x128xf32>,
    return
  }
}

</mosaic_0001>

<bundles_post_ra>
// kernel: f_addnode_forward.1
= control target key start
LH: loop header
LB: loop body
LE: loop exit
PB: predicated region body
PF: predicated region fallthrough
CT: control target
= control target key end

     0   :  { %8 = vsyncpa [#allocation3], 0  ;;  %s295_s0 = inlined_call_operand.hbm [shape: f32[8,32], index: 0, kind: input, shape index: {}]   ;;  %s296_s1 = inlined_call_operand.hbm [shape: f32[32,128], index: 1, kind: input, shape index: {}]   ;;  %s297_s2 = inlined_call_operand.vmem [shape: f32[1,128], index: 2, kind: input, shape index: {}]   ;;  %s298_s3 = inlined_call_operand.hbm [shape: f32[8,128], index: 3, kind: output, shape index: {}]  }
   0x1   :  { %9 = vsyncpa [#allocation6], 0 }
   0x2   :  { %10 = vsyncpa [#allocation4], 0  ;;  %s256_s12 = smov [#allocation2]   ;;  %s257_s14 = smov [#allocation5]  }
   0x3   :  { %s17_s13 = sshll.u32 %s256_s12, 4  ;;  %s26_s15 = sshll.u32 %s257_s14, 4  ;;  %s18_s13 = int_to_ptr.vmem [resolvable:$true] %s17_s13  ;;  %s27_s15 = int_to_ptr.vmem [resolvable:$true] %s26_s15 }
   0x4   :  { %s198_s16 = scalar_lea.vmem %s18_s13, 128  ;;  %p203_p1 = scmp.lt.s32.totalorder %s18_s13, %s18_s13 }
   0x5   :  { %p199_p0 = scmp.ne.s32.totalorder %s18_s13, %s198_s16  ;;  %p204_p2 = scmp.lt.s32.totalorder %s198_s16, %s198_s16 }
   0x7   :  { %p205_p3 = por %p204_p2, %p203_p1 }
   0x9   :  { %p206_p4 = pnand %p205_p3, %p199_p0 }
   0xb   :  { %209 = shalt.err (!%p206_p4)
}
   0xc   :  { %20 = dma.hbm_to_vmem [thread:$0]  %s295_s0, 128, %s18_s13, [#allocation3]  }
   0xd   :  { %s218_s19 = scalar_lea.vmem %s27_s15, 512  ;;  %p223_p6 = scmp.lt.s32.totalorder %s27_s15, %s27_s15 }
   0xe   :  { %p219_p5 = scmp.ne.s32.totalorder %s27_s15, %s218_s19  ;;  %p224_p7 = scmp.lt.s32.totalorder %s218_s19, %s218_s19 }
  0x10   :  { %p225_p8 = por %p224_p7, %p223_p6 }
  0x12   :  { %p226_p9 = pnand %p225_p8, %p219_p5 }
  0x14   :  { %229 = shalt.err (!%p226_p9)
}
  0x15   :  { %s258_s20 = smov 128   ;;  %s259_s21 = smov 8  }
  0x16   :  { %32 = dma.hbm_to_vmem [thread:$0]  %s296_s1, 512, %s27_s15, [#allocation6], %s258_s20, %s258_s20, %s259_s21  }
  0x17   :  { %250 = dma.done.wait [#allocation3], 128  }
  0x18   :  { %251 = vsyncadd [#allocation3], 4294967168 }
  0x19   :  { %252 = dma.done.wait [#allocation6], 512  }
  0x1a   :  { %253 = vsyncadd [#allocation6], 4294966784  ;;  %v260_v0 = vmov 0.0   ;;  %vm261_vm0 = vmmov 0   ;;  %v45_v1 = vld [vmem:[#allocation5 + $0x18] sm:$0xff]  ;;  %v44_v2 = vld [vmem:[#allocation5 + $0x10] sm:$0xff] }
  0x1b   :  { %168 = vmatprep.subr.mxu0 %v260_v0  ;;  %176 = vmatprep.mubr.msk.f32.mxu0 %vm261_vm0, %v260_v0  ;;  %v43_v3 = vld [vmem:[#allocation5 + $0x8] sm:$0xff]  ;;  %v42_v4 = vld [vmem:[#allocation5] sm:$0xff]  ;;  %v41_v5 = vld [vmem:[#allocation2] sm:$0xff]  ;;  %vm53_vm1 = vcmask 261120  }
  0x1c   :  { %169 = vmatpush3.msra.mxu0 %v45_v1  ;;  %v161_v6 = vld [vmem:[%s297_s2] ss:$0 sm:$0xff]  ;;  %s262_s2 = smov [#allocation7]  }
  0x1d   :  { %170 = vmatprep.subr.mxu0 %v260_v0  ;;  %s151_s24 = sshll.u32 %s262_s2, 4  ;;  %s152_s24 = int_to_ptr.vmem [resolvable:$true] %s151_s24 }
  0x1e   :  { %171 = vmatpush3.msra.mxu0 %v44_v2  ;;  %s230_s25 = scalar_lea.vmem %s152_s24, 128  ;;  %p235_p11 = scmp.lt.s32.totalorder %s152_s24, %s152_s24 }
  0x1f   :  { %172 = vmatprep.subr.mxu0 %v260_v0  ;;  %p231_p10 = scmp.ne.s32.totalorder %s152_s24, %s230_s25  ;;  %p236_p12 = scmp.lt.s32.totalorder %s230_s25, %s230_s25 }
  0x20   :  { %173 = vmatpush3.msra.mxu0 %v43_v3 }
  0x21   :  { %174 = vmatprep.subr.mxu0 %v260_v0  ;;  %p237_p13 = por %p236_p12, %p235_p11 }
  0x22   :  { %175 = vmatpush3.msra.mxu0 %v42_v4 }
  0x23   :  { %177 = vmatmul.mubr.msk.f32.vlgmr.msra.gmra.mxu0 %vm53_vm1, %v41_v5  ;;  %p238_p0 = pnand %p237_p13, %p231_p10 }
  0xe3   :  { %v123_v7 = vpop.f32.mrf.mxu0 }
  0xe4   :  { %v124_v8 = vadd.f32 %v161_v6, %v123_v7 }
  0xe5   :  { %v178_v9 = vpop.f32.mrf.mxu0 }
  0xe6   :  { %v127_v10 = vrot.slane %v124_v8, 4 }
  0xe8   :  { %v128_v11 = vmax.f32 %v124_v8, %v127_v10 }
  0xea   :  { %v129_v12 = vrot.slane %v128_v11, 2 }
  0xec   :  { %v130_v13 = vmax.f32 %v128_v11, %v129_v12 }
  0xee   :  { %v131_v14 = vrot.slane %v130_v13, 1 }
  0xf0   :  { %v132_v15 = vmax.f32 %v130_v13, %v131_v14 }
  0xf2   :  { %v133_v16 = vsub.f32 %v124_v8, %v132_v15 }
  0xf4   :  { %v134_v17 = vmul.f32 1.442695, %v133_v16 }
  0xf6   :  { %186 = vpow2.f32 %v134_v17 }
 0x103   :  { %v187_v18 = vpop.eup %186 }
 0x104   :  { %v136_v19 = vrot.slane %v187_v18, 4 }
 0x106   :  { %v137_v20 = vadd.f32 %v187_v18, %v136_v19 }
 0x108   :  { %v138_v21 = vrot.slane %v137_v20, 2 }
 0x10a   :  { %v139_v22 = vadd.f32 %v138_v21, %v137_v20 }
 0x10c   :  { %v140_v23 = vrot.slane %v139_v22, 1 }
 0x10e   :  { %v141_v24 = vadd.f32 %v140_v23, %v139_v22 }
 0x110   :  { %188 = vrcp.f32 %v141_v24 }
 0x11d   :  { %v189_v25 = vpop.eup %188 }
 0x11e   :  { %v143_v26 = vmul.f32 %v189_v25, %v187_v18 }
 0x120   :  { %144 = vst [vmem:[#allocation7] sm:$0xff] %v143_v26 }
 0x121   :  { %241 = shalt.err (!%p238_p0)
}
 0x122   :  { %154 = dma.vmem_to_hbm [thread:$0]  %s152_s24, 128, %s298_s3, [#allocation4]  }
 0x123   :  { %254 = dma.done.wait [#allocation4], 128  }
 0x124   :  { %255 = vsyncadd [#allocation4], 4294967168 }
 0x125   :  { %158 = vsyncpa [#allocation3], 1 }
 0x126   :  { %159 = vsyncpa [#allocation6], 1 }
 0x127   :  { %160 = vsyncpa [#allocation4], 1 }

</bundles_post_ra>
